<compile_context>
chip_gen: v7x
topology: tpu7x:2x2x1
jax: 0.10.0
libtpu: 0.0.40
codegen_flags: <defaults>
</compile_context>

<pallas_src>
import functools

import jax
import jax.numpy as jnp
from jax.experimental import pallas as pl
from jax.experimental.pallas import tpu as pltpu

ALPHA = 0.25
BETA = 2.0               # beta == 2 is folded in as p*p inside the kernel
PIXELS_PER_ROW = 128     # pixels folded into the lane axis per row
_BLOCK_BUDGET_BYTES = 2 << 20   # f32 bytes per input block per pipeline buffer


def _elementwise_loss(p_ref, q_ref, eps):
    """Per-element varifocal loss on one (tr, 128*C) tile, in f32."""
    p = p_ref[...].astype(jnp.float32)
    q = q_ref[...].astype(jnp.float32)
    log_p = jnp.log(p + eps)
    log_1mp = jnp.log(1.0 - p + eps)
    qsq = q * q
    # loss = where(q != 0, -q*(q*log_p + (1-q)*log_1mp), -alpha*p^2*log_1mp)
    #      = -(q^2*log_p + where(q != 0, q - q^2, alpha*p^2)*log_1mp)
    coef = jnp.where(q != 0.0, q - qsq, ALPHA * (p * p))
    return -(qsq * log_p + coef * log_1mp)


def _varifocal_map_kernel(p_ref, q_ref, o_ref, *, eps, channels):
    # reduction=None path: per-pixel channel mean, lane-dense (tr, 128) output.
    loss = _elementwise_loss(p_ref, q_ref, eps)              # (tr, 128*C)
    row_width = loss.shape[1]
    # Block-diagonal averaging matrix A[k, j] = 1/C iff k // C == j, built
    # in-kernel (constant operand -> no HBM fetch, no pipeline buffer).
    k_iota = jax.lax.broadcasted_iota(jnp.int32, (row_width, PIXELS_PER_ROW), 0)
    j_iota = jax.lax.broadcasted_iota(jnp.int32, (row_width, PIXELS_PER_ROW), 1)
    d = k_iota - j_iota * channels
    avg = jnp.where((d >= 0) & (d < channels),
                    jnp.float32(1.0 / channels), jnp.float32(0.0))
    # Channel mean on the MXU: (tr, 128*C) @ (128*C, 128) -> (tr, 128).
    o_ref[...] = jnp.dot(loss, avg, preferred_element_type=jnp.float32)


def _varifocal_sum_kernel(p_ref, q_ref, o_ref, *, eps, n_rows, tile_rows):
    # reduction='mean'/'sum' path: per-block partial sums (lane-dense block).
    loss = _elementwise_loss(p_ref, q_ref, eps)              # (tr, 128*C)
    # The last grid block may extend past R with garbage rows; they were
    # harmless when rows were independent, but we reduce across rows here,
    # so mask them explicitly.
    row = tile_rows * pl.program_id(0) + jax.lax.broadcasted_iota(
        jnp.int32, loss.shape, 0)
    loss = jnp.where(row < n_rows, loss, 0.0)
    partial = jnp.sum(loss, axis=0, keepdims=True)           # (1, 128*C)
    # Write a lane-dense (8, 128*C) block: partial sums in sublane 0, zeros
    # elsewhere (wrapper sums everything).
    sub = jax.lax.broadcasted_iota(jnp.int32, o_ref.shape, 0)
    o_ref[...] = jnp.where(sub == 0,
                           jnp.broadcast_to(partial, o_ref.shape), 0.0)


def _choose_tile_rows(n_rows, row_width):
    """Rows per block from a VMEM byte budget; multiple of 8 (or == n_rows)."""
    bytes_per_row = row_width * 4                 # f32 working set per row
    tr = max(8, _BLOCK_BUDGET_BYTES // bytes_per_row)
    tr = min((tr // 8) * 8, 1024)
    if n_rows > 8:
        # Guarantee >= 2 grid blocks so a v7x megacore can shard the axis.
        half = ((pl.cdiv(n_rows, 2) + 7) // 8) * 8
        tr = min(tr, half)
    return max(min(tr, n_rows), 1)


def _vmem_limit_bytes(tr, row_width):
    block_in = tr * row_width * 4
    block_out = tr * PIXELS_PER_ROW * 4
    est = (2 * 2 * block_in                         # 2 inputs, double-buffered
           + 2 * max(block_out, 8 * row_width * 4)  # output, double-buffered
           + 4 * block_in                           # in-kernel f32 temps / dot LHS
           + row_width * PIXELS_PER_ROW * 4         # averaging matrix
           + (4 << 20))                             # slack / internal scratch
    return int(min(max(est, 32 << 20), 48 << 20))


def varifocal_loss(out_score_map, target_score_map, reduction=None, eps=1e-9):
    """Matches VarifocalLoss(reduction, eps).forward semantics."""
    assert reduction in (None, "mean", "sum")
    assert out_score_map.shape == target_score_map.shape

    orig_shape = out_score_map.shape
    C = orig_shape[-1]
    spatial_shape = orig_shape[:-1]
    M = 1
    for d in spatial_shape:
        M *= d

    row_width = PIXELS_PER_ROW * C   # 128 pixels x C channels per lane-dense row

    p = out_score_map.reshape(-1)
    q = target_score_map.reshape(-1)
    N = p.shape[0]                   # == M * C

    # Pad only the sub-row tail so the flat buffer reshapes to (R, 128*C).
    # Padded fake pixels have p = q = 0 -> their elementwise loss is exactly 0
    # (and the corresponding per-pixel outputs are sliced off below).
    N_pad = pl.cdiv(N, row_width) * row_width
    if N_pad != N:
        p = jnp.pad(p, (0, N_pad - N))
        q = jnp.pad(q, (0, N_pad - N))

    R = N_pad // row_width
    p = p.reshape(R, row_width)
    q = q.reshape(R, row_width)

    tr = _choose_tile_rows(R, row_width)
    n_blocks = pl.cdiv(R, tr)
    grid = (n_blocks,)
    vmem_limit = _vmem_limit_bytes(tr, row_width)
    in_bytes = p.size * p.dtype.itemsize + q.size * q.dtype.itemsize

    in_specs = [pl.BlockSpec((tr, row_width), lambda i: (i, 0)),
                pl.BlockSpec((tr, row_width), lambda i: (i, 0))]
    compiler_params = pltpu.CompilerParams(
        dimension_semantics=("parallel",), vmem_limit_bytes=vmem_limit)

    if reduction is None:
        kernel = functools.partial(_varifocal_map_kernel, eps=eps, channels=C)
        cost = pl.CostEstimate(
            flops=int(12 * N_pad + 2 * R * row_width * PIXELS_PER_ROW),
            transcendentals=int(2 * N_pad),
            bytes_accessed=int(in_bytes + R * PIXELS_PER_ROW * 4))
        per_pixel = pl.pallas_call(
            kernel,
            out_shape=jax.ShapeDtypeStruct((R, PIXELS_PER_ROW), jnp.float32),
            grid=grid,
            in_specs=in_specs,
            out_specs=pl.BlockSpec((tr, PIXELS_PER_ROW), lambda i: (i, 0)),
            compiler_params=compiler_params,
            cost_estimate=cost,
        )(p, q)
        # per_pixel[r, j] is pixel (128*r + j); drop padding, restore shape.
        return per_pixel.reshape(-1)[:M].reshape(spatial_shape)

    # reduction == 'mean' / 'sum': fused reduction -> per-block partial sums of
    # the ELEMENTWISE loss; the channel mean becomes a final divide by C.
    kernel = functools.partial(_varifocal_sum_kernel, eps=eps,
                               n_rows=R, tile_rows=tr)
    cost = pl.CostEstimate(
        flops=int(15 * N_pad),
        transcendentals=int(2 * N_pad),
        bytes_accessed=int(in_bytes + n_blocks * 8 * row_width * 4))
    partials = pl.pallas_call(
        kernel,
        out_shape=jax.ShapeDtypeStruct((n_blocks * 8, row_width), jnp.float32),
        grid=grid,
        in_specs=in_specs,
        out_specs=pl.BlockSpec((8, row_width), lambda i: (i, 0)),
        compiler_params=compiler_params,
        cost_estimate=cost,
    )(p, q)
    total = jnp.sum(partials)        # sum of elementwise loss over real elements
    if reduction == "sum":
        return total / C             # sum over pixels of per-pixel channel mean
    return total / (C * M)           # mean over pixels


def _reference(p, q, reduction=None, eps=1e-9):
    p = p.astype(jnp.float32)
    q = q.astype(jnp.float32)
    pos = -q * (q * jnp.log(p + eps) + (1.0 - q) * jnp.log(1.0 - p + eps))
    neg = -ALPHA * (p ** BETA) * jnp.log(1.0 - p + eps)
    loss = jnp.where(q != 0.0, pos, neg)
    loss = jnp.mean(loss, axis=-1)
    if reduction is None:
        return loss
    elif reduction == "mean":
        return jnp.mean(loss)
    else:
        return jnp.sum(loss)


if __name__ == "__main__":
    key = jax.random.PRNGKey(0)
    k1, k2, k3 = jax.random.split(key, 3)

    b, h, w, c = 2, 16, 16, 4
    # predictions are probabilities in (0, 1)
    out_score_map = jax.random.uniform(k1, (b, h, w, c),
                                       minval=0.01, maxval=0.99)
    # targets: soft scores, ~half of the entries exactly zero (negatives)
    tgt = jax.random.uniform(k2, (b, h, w, c), minval=0.05, maxval=1.0)
    mask = jax.random.bernoulli(k3, p=0.5, shape=(b, h, w, c))
    target_score_map = jnp.where(mask, tgt, 0.0)

    # reduction=None (module default): per-pixel loss of shape (b, h, w)
    result = varifocal_loss(out_score_map, target_score_map, reduction=None)
    result = jax.block_until_ready(result)
    ref = _reference(out_score_map, target_score_map, reduction=None)
    assert result.shape == (b, h, w)
    assert jnp.allclose(result, ref, atol=1e-5, rtol=1e-5)

    # fused 'mean' and 'sum' reductions
    for red in ("mean", "sum"):
        r = jax.block_until_ready(
            varifocal_loss(out_score_map, target_score_map, reduction=red))
        assert jnp.allclose(r, _reference(out_score_map, target_score_map,
                                          reduction=red), atol=1e-4, rtol=1e-4)

    # non-batched (h, w, 4) input whose pixel count is NOT a multiple of 128
    # (exercises the sub-row tail-padding path, both kernels)
    h2, w2 = 9, 7
    p2 = jax.random.uniform(k1, (h2, w2, c), minval=0.01, maxval=0.99)
    q2 = jnp.where(jax.random.bernoulli(k3, p=0.5, shape=(h2, w2, c)),
                   jax.random.uniform(k2, (h2, w2, c), minval=0.05, maxval=1.0),
                   0.0)
    r2 = jax.block_until_ready(varifocal_loss(p2, q2, reduction=None))
    assert r2.shape == (h2, w2)
    assert jnp.allclose(r2, _reference(p2, q2, reduction=None),
                        atol=1e-5, rtol=1e-5)
    r2s = jax.block_until_ready(varifocal_loss(p2, q2, reduction="sum"))
    assert jnp.allclose(r2s, _reference(p2, q2, reduction="sum"),
                        atol=1e-4, rtol=1e-4)

    # shape giving R=9 rows -> 2 grid blocks with a partial last block:
    # exercises the multi-block "parallel" grid and the fused-reduction masking
    b3, h3, w3 = 2, 24, 24
    p3 = jax.random.uniform(k1, (b3, h3, w3, c), minval=0.01, maxval=0.99)
    q3 = jnp.where(jax.random.bernoulli(k3, p=0.5, shape=(b3, h3, w3, c)),
                   jax.random.uniform(k2, (b3, h3, w3, c), minval=0.05, maxval=1.0),
                   0.0)
    for red in (None, "mean", "sum"):
        r3 = jax.block_until_ready(varifocal_loss(p3, q3, reduction=red))
        ref3 = _reference(p3, q3, reduction=red)
        if red is None:
            assert r3.shape == (b3, h3, w3)
            assert jnp.allclose(r3, ref3, atol=1e-5, rtol=1e-5)
        else:
            assert jnp.allclose(r3, ref3, atol=1e-4, rtol=1e-4)

    print("KERNEL_OK")
</pallas_src>

<mosaic_0001>
module attributes {stable_mosaic.version = 11 : i64} {
  func.func @_varifocal_map_kernel(%arg0: i32, %arg1: memref<4x512xf32, #tpu.memory_space<vmem>>, %arg2: memref<4x512xf32, #tpu.memory_space<vmem>>, %arg3: memref<4x128xf32, #tpu.memory_space<vmem>>) attributes {dimension_semantics = [#tpu.dimension_semantics<parallel>], iteration_bounds = array<i64: 1>, scalar_prefetch = 0 : i64, scratch_operands = 0 : i64, tpu.core_type = #tpu.core_type<tc>, window_params = [{transform_indices = @transform_0, window_bounds = array<i64: 4, 512>}, {transform_indices = @transform_1, window_bounds = array<i64: 4, 512>}, {transform_indices = @transform_2, window_bounds = array<i64: 4, 128>}]} {
    %c0 = arith.constant 0 : index
    %c0_0 = arith.constant 0 : index
    %0 = vector.load %arg1[%c0, %c0_0] : memref<4x512xf32, #tpu.memory_space<vmem>>, vector<4x512xf32>
    %c0_1 = arith.constant 0 : index
    %c0_2 = arith.constant 0 : index
    %1 = vector.load %arg2[%c0_1, %c0_2] : memref<4x512xf32, #tpu.memory_space<vmem>>, vector<4x512xf32>
    %cst = arith.constant 9.99999971E-10 : f32
    %2 = vector.broadcast %cst : f32 to vector<4x512xf32>
    %3 = arith.addf %0, %2 : vector<4x512xf32>
    %4 = math.log %3 : vector<4x512xf32>
    %cst_3 = arith.constant 1.000000e+00 : f32
    %5 = vector.broadcast %cst_3 : f32 to vector<4x512xf32>
    %6 = arith.subf %5, %0 : vector<4x512xf32>
    %cst_4 = arith.constant 9.99999971E-10 : f32
    %7 = vector.broadcast %cst_4 : f32 to vector<4x512xf32>
    %8 = arith.addf %6, %7 : vector<4x512xf32>
    %9 = math.log %8 : vector<4x512xf32>
    %10 = arith.mulf %1, %1 : vector<4x512xf32>
    %cst_5 = arith.constant 0.000000e+00 : f32
    %11 = vector.broadcast %cst_5 : f32 to vector<4x512xf32>
    %12 = arith.cmpf one, %1, %11 : vector<4x512xf32>
    %13 = arith.subf %1, %10 : vector<4x512xf32>
    %14 = arith.mulf %0, %0 : vector<4x512xf32>
    %cst_6 = arith.constant 2.500000e-01 : f32
    %15 = vector.broadcast %cst_6 : f32 to vector<4x512xf32>
    %16 = arith.mulf %15, %14 : vector<4x512xf32>
    %17 = arith.select %12, %13, %16 : vector<4x512xi1>, vector<4x512xf32>
    %18 = arith.mulf %10, %4 : vector<4x512xf32>
    %19 = arith.mulf %17, %9 : vector<4x512xf32>
    %20 = arith.addf %18, %19 : vector<4x512xf32>
    %cst_7 = arith.constant 0.000000e+00 : f32
    %21 = vector.broadcast %cst_7 : f32 to vector<4x512xf32>
    %22 = arith.subf %21, %20 : vector<4x512xf32>
    %23 = tpu.iota {dimensions = array<i32: 0>} : vector<512x128xi32>
    %24 = tpu.iota {dimensions = array<i32: 1>} : vector<512x128xi32>
    %c4_i32 = arith.constant 4 : i32
    %25 = vector.broadcast %c4_i32 : i32 to vector<512x128xi32>
    %26 = arith.muli %24, %25 : vector<512x128xi32>
    %27 = arith.subi %23, %26 : vector<512x128xi32>
    %c0_i32 = arith.constant 0 : i32
    %28 = vector.broadcast %c0_i32 : i32 to vector<512x128xi32>
    %29 = arith.cmpi sge, %27, %28 : vector<512x128xi32>
    %c4_i32_8 = arith.constant 4 : i32
    %30 = vector.broadcast %c4_i32_8 : i32 to vector<512x128xi32>
    %31 = arith.cmpi slt, %27, %30 : vector<512x128xi32>
    %32 = arith.andi %29, %31 : vector<512x128xi1>
    %cst_9 = arith.constant 2.500000e-01 : f32
    %cst_10 = arith.constant 0.000000e+00 : f32
    %33 = vector.broadcast %cst_9 : f32 to vector<512x128xf32>
    %34 = vector.broadcast %cst_10 : f32 to vector<512x128xf32>
    %35 = arith.select %32, %33, %34 : vector<512x128xi1>, vector<512x128xf32>
    %cst_11 = arith.constant dense<0.000000e+00> : vector<4x128xf32>
    %36 = tpu.matmul %22, %35, %cst_11 {dimension_numbers = #tpu.dot_dimension_numbers<[1], [0], [0], [1], [0, 0, 1, 1], [], []>} : vector<4x512xf32>, vector<512x128xf32>, vector<4x128xf32> -> vector<4x128xf32>
    %c0_12 = arith.constant 0 : index
    %c0_13 = arith.constant 0 : index
    %37 = vector.load %arg3[%c0_12, %c0_13] : memref<4x128xf32, #tpu.memory_space<vmem>>, vector<4x128xf32>
    tpu.vector_store %arg3[%c0_12, %c0_13], %36 {strides = array<i32>} : memref<4x128xf32, #tpu.memory_space<vmem>>, vector<4x128xf32>,
    return
  }
  func.func @transform_0(%arg0: i32) -> (i32, i32) {
    %c0_i32 = arith.constant 0 : i32
    %c0_i32_0 = arith.constant 0 : i32
    return %arg0, %c0_i32 : i32, i32
  }
  func.func @transform_1(%arg0: i32) -> (i32, i32) {
    %c0_i32 = arith.constant 0 : i32
    %c0_i32_0 = arith.constant 0 : i32
    return %arg0, %c0_i32 : i32, i32
  }
  func.func @transform_2(%arg0: i32) -> (i32, i32) {
    %c0_i32 = arith.constant 0 : i32
    %c0_i32_0 = arith.constant 0 : i32
    return %arg0, %c0_i32 : i32, i32
  }
}

</mosaic_0001>

<bundles_post_ra>
// kernel: tpu_custom_call.1
= control target key start
LH: loop header
LB: loop body
LE: loop exit
PB: predicated region body
PF: predicated region fallthrough
CT: control target
= control target key end

     0   :  { %7 = vsyncpa [#allocation3], 0  ;;  %s1363_s0 = inlined_call_operand.hbm [shape: f32[4,512], index: 0, kind: input, shape index: {}]   ;;  %s1364_s1 = inlined_call_operand.hbm [shape: f32[4,512], index: 1, kind: input, shape index: {}]   ;;  %s1365_s2 = inlined_call_operand.hbm [shape: f32[4,128], index: 2, kind: output, shape index: {}]  }
   0x1   :  { %8 = vsyncpa [#allocation6], 0 }
   0x2   :  { %9 = vsyncpa [#allocation4], 0  ;;  %s907_s9 = smov [#allocation2]   ;;  %s908_s11 = smov [#allocation5]  }
   0x3   :  { %s16_s10 = sshll.u32 %s907_s9, 4  ;;  %s26_s12 = sshll.u32 %s908_s11, 4  ;;  %s17_s10 = int_to_ptr.vmem [resolvable:$true] %s16_s10  ;;  %s27_s12 = int_to_ptr.vmem [resolvable:$true] %s26_s12 }
   0x4   :  { %s835_s15 = scalar_lea.hbm %s1363_s0, 256 }
   0x5   :  { %p836_p0 = scmp.ne.s32.totalorder %s1363_s0, %s835_s15  ;;  %p839_p1 = scmp.lt.u32.totalorder %s835_s15, %s1363_s0 }
   0x7   :  { %p841_p2 = pnand %p839_p1, %p836_p0 }
   0x9   :  { %844 = shalt.err (!%p841_p2)
}
   0xa   :  { %s845_s20 = scalar_lea.vmem %s17_s10, 256  ;;  %p850_p4 = scmp.lt.s32.totalorder %s17_s10, %s17_s10 }
   0xb   :  { %p846_p3 = scmp.ne.s32.totalorder %s17_s10, %s845_s20  ;;  %p851_p5 = scmp.lt.s32.totalorder %s845_s20, %s845_s20 }
   0xd   :  { %p852_p6 = por %p851_p5, %p850_p4 }
   0xf   :  { %p853_p7 = pnand %p852_p6, %p846_p3 }
  0x11   :  { %856 = shalt.err (!%p853_p7)
}
  0x12   :  { %19 = dma.hbm_to_vmem [thread:$0]  %s1363_s0, 256, %s17_s10, [#allocation3]  }
  0x13   :  { %s857_s25 = scalar_lea.hbm %s1364_s1, 256 }
  0x14   :  { %p858_p8 = scmp.ne.s32.totalorder %s1364_s1, %s857_s25  ;;  %p861_p9 = scmp.lt.u32.totalorder %s857_s25, %s1364_s1 }
  0x16   :  { %p863_p10 = pnand %p861_p9, %p858_p8 }
  0x18   :  { %866 = shalt.err (!%p863_p10)
}
  0x19   :  { %s867_s30 = scalar_lea.vmem %s27_s12, 256  ;;  %p872_p12 = scmp.lt.s32.totalorder %s27_s12, %s27_s12 }
  0x1a   :  { %p868_p11 = scmp.ne.s32.totalorder %s27_s12, %s867_s30  ;;  %p873_p13 = scmp.lt.s32.totalorder %s867_s30, %s867_s30 }
  0x1c   :  { %p874_p0 = por %p873_p13, %p872_p12 }
  0x1e   :  { %p875_p1 = pnand %p874_p0, %p868_p11 }
  0x20   :  { %878 = shalt.err (!%p875_p1)
}
  0x21   :  { %29 = dma.hbm_to_vmem [thread:$0]  %s1364_s1, 256, %s27_s12, [#allocation6]  }
  0x22   :  { %901 = dma.done.wait [#allocation3], 256  }
  0x23   :  { %902 = vsyncadd [#allocation3], 4294967040 }
  0x24   :  { %903 = dma.done.wait [#allocation6], 256  }
  0x25   :  { %904 = vsyncadd [#allocation6], 4294967040  ;;  %v74_v0 = vlaneseq  ;;  %v909_v19 = vmov 0.25|0.25   ;;  %s910_s1 = smov [#allocation7]  }
  0x26   :  { %s615_s4 = sshll.u32 %s910_s1, 4  ;;  %s616_s4 = int_to_ptr.vmem [resolvable:$true] %s615_s4 }
  0x27   :  { %v950_v1 = vshrl.u32 %v74_v0, 7  ;;  %v140_v2 = vand.u32 127, %v74_v0  ;;  %s879_s5 = scalar_lea.vmem %s616_s4, 64  ;;  %p884_p3 = scmp.lt.s32.totalorder %s616_s4, %s616_s4 }
  0x28   :  { %p880_p2 = scmp.ne.s32.totalorder %s616_s4, %s879_s5  ;;  %p885_p4 = scmp.lt.s32.totalorder %s879_s5, %s879_s5 }
  0x29   :  { %v91_v3 = vadd.s32 128, %v950_v1  ;;  %v92_v4 = vadd.s32 136, %v950_v1  ;;  %v954_v5 = vmul.u32 4, %v140_v2  ;;  %v123_v6 = vadd.s32 384, %v950_v1 }
  0x2a   :  { %v124_v7 = vadd.s32 392, %v950_v1  ;;  %v76_v8 = vadd.s32 8, %v950_v1  ;;  %v107_v14 = vadd.s32 256, %v950_v1  ;;  %v108_v15 = vadd.s32 264, %v950_v1  ;;  %p886_p5 = por %p885_p4, %p884_p3 }
  0x2b   :  { %v158_v9 = vsub.s32 %v91_v3, %v954_v5  ;;  %v159_v10 = vsub.s32 %v92_v4, %v954_v5  ;;  %v190_v11 = vsub.s32 %v123_v6, %v954_v5  ;;  %v142_v13 = vsub.s32 %v950_v1, %v954_v5 }
  0x2c   :  { %v191_v12 = vsub.s32 %v124_v7, %v954_v5  ;;  %v143_v16 = vsub.s32 %v76_v8, %v954_v5  ;;  %v174_v17 = vsub.s32 %v107_v14, %v954_v5  ;;  %v175_v18 = vsub.s32 %v108_v15, %v954_v5  ;;  %p887_p6 = pnand %p886_p5, %p880_p2 }
  0x2d   :  { %vm222_vm0 = vcmp.ge.s32.totalorder %v158_v9, 0  ;;  %vm223_vm1 = vcmp.ge.s32.totalorder %v159_v10, 0  ;;  %vm286_vm2 = vcmp.lt.s32.totalorder %v158_v9, 4  ;;  %vm287_vm3 = vcmp.lt.s32.totalorder %v159_v10, 4 }
  0x2e   :  { %vm350_vm4 = vmand %vm222_vm0, %vm286_vm2  ;;  %vm254_vm5 = vcmp.ge.s32.totalorder %v190_v11, 0  ;;  %vm318_vm6 = vcmp.lt.s32.totalorder %v190_v11, 4  ;;  %vm255_vm8 = vcmp.ge.s32.totalorder %v191_v12, 0  ;;  %vm319_vm9 = vcmp.lt.s32.totalorder %v191_v12, 4 }
  0x2f   :  { %vm351_vm7 = vmand %vm223_vm1, %vm287_vm3  ;;  %vm206_vm12 = vcmp.ge.s32.totalorder %v142_v13, 0  ;;  %vm270_vm13 = vcmp.lt.s32.totalorder %v142_v13, 4  ;;  %v93_v20 = vadd.s32 144, %v950_v1  ;;  %v94_v21 = vadd.s32 152, %v950_v1 }
  0x30   :  { %vm759_vm10 = vmpackc.low %vm351_vm7, %vm350_vm4  ;;  %vm207_vm15 = vcmp.ge.s32.totalorder %v143_v16, 0  ;;  %vm271_vm0 = vcmp.lt.s32.totalorder %v143_v16, 4  ;;  %v125_v22 = vadd.s32 400, %v950_v1  ;;  %v126_v24 = vadd.s32 408, %v950_v1 }
  0x31   :  { %760 = vmatprep.subr.msk.bf16.mxu0 %vm759_vm10, %v909_v19  ;;  %vm382_vm11 = vmand %vm254_vm5, %vm318_vm6  ;;  %v160_v23 = vsub.s32 %v93_v20, %v954_v5  ;;  %vm238_vm3 = vcmp.ge.s32.totalorder %v174_v17, 0  ;;  %vm302_vm4 = vcmp.lt.s32.totalorder %v174_v17, 4  ;;  %v161_v25 = vsub.s32 %v94_v21, %v954_v5 }
  0x32   :  { %vm383_vm14 = vmand %vm255_vm8, %vm319_vm9  ;;  %vm239_vm6 = vcmp.ge.s32.totalorder %v175_v18, 0  ;;  %vm303_vm7 = vcmp.lt.s32.totalorder %v175_v18, 4  ;;  %v77_v26 = vadd.s32 16, %v950_v1  ;;  %v192_v27 = vsub.s32 %v125_v22, %v954_v5 }
  0x33   :  { %vm791_vm1 = vmpackc.low %vm383_vm14, %vm382_vm11  ;;  %v78_v28 = vadd.s32 24, %v950_v1  ;;  %vm224_vm10 = vcmp.ge.s32.totalorder %v160_v23, 0  ;;  %vm288_vm11 = vcmp.lt.s32.totalorder %v160_v23, 4  ;;  %v193_v29 = vsub.s32 %v126_v24, %v954_v5 }
  0x34   :  { %792 = vmatprep.subr.msk.bf16.mxu1 %vm791_vm1, %v909_v19  ;;  %vm334_vm2 = vmand %vm206_vm12, %vm270_vm13  ;;  %vm225_vm13 = vcmp.ge.s32.totalorder %v161_v25, 0  ;;  %vm289_vm14 = vcmp.lt.s32.totalorder %v161_v25, 4  ;;  %v109_v30 = vadd.s32 272, %v950_v1  ;;  %v144_v31 = vsub.s32 %v77_v26, %v954_v5 }
  0x35   :  { %vm335_vm5 = vmand %vm207_vm15, %vm271_vm0  ;;  %v110_v32 = vadd.s32 280, %v950_v1  ;;  %vm256_vm1 = vcmp.ge.s32.totalorder %v192_v27, 0  ;;  %v145_v33 = vsub.s32 %v78_v28, %v954_v5  ;;  %v95_v34 = vadd.s32 160, %v950_v1 }
  0x36   :  { %vm761_vm8 = vmpackc.low %vm335_vm5, %vm334_vm2  ;;  %vm320_vm2 = vcmp.lt.s32.totalorder %v192_v27, 4  ;;  %vm321_vm5 = vcmp.lt.s32.totalorder %v193_v29, 4  ;;  %v176_v35 = vsub.s32 %v109_v30, %v954_v5  ;;  %v96_v36 = vadd.s32 168, %v950_v1 }
  0x37   :  { %762 = vmatpush3.bf16.msk.msra.mxu0 %vm761_vm8, %v909_v19  ;;  %vm366_vm9 = vmand %vm238_vm3, %vm302_vm4  ;;  %vm257_vm4 = vcmp.ge.s32.totalorder %v193_v29, 0  ;;  %vm208_vm8 = vcmp.ge.s32.totalorder %v144_v31, 0  ;;  %v177_v37 = vsub.s32 %v110_v32, %v954_v5  ;;  %v127_v38 = vadd.s32 416, %v950_v1 }
  0x38   :  { %vm367_vm12 = vmand %vm239_vm6, %vm303_vm7  ;;  %v162_v39 = vsub.s32 %v95_v34, %v954_v5  ;;  %v128_v40 = vadd.s32 424, %v950_v1  ;;  %v163_v41 = vsub.s32 %v96_v36, %v954_v5  ;;  %v79_v42 = vadd.s32 32, %v950_v1 }
  0x39   :  { %vm793_vm15 = vmpackc.low %vm367_vm12, %vm366_vm9  ;;  %vm272_vm9 = vcmp.lt.s32.totalorder %v144_v31, 4  ;;  %vm273_vm12 = vcmp.lt.s32.totalorder %v145_v33, 4  ;;  %v80_v43 = vadd.s32 40, %v950_v1  ;;  %v111_v44 = vadd.s32 288, %v950_v1 }
  0x3a   :  { %794 = vmatpush3.bf16.msk.msra.mxu1 %vm793_vm15, %v909_v19  ;;  %vm352_vm0 = vmand %vm224_vm10, %vm288_vm11  ;;  %vm209_vm11 = vcmp.ge.s32.totalorder %v145_v33, 0  ;;  %vm240_vm15 = vcmp.ge.s32.totalorder %v176_v35, 0  ;;  %v194_v45 = vsub.s32 %v127_v38, %v954_v5  ;;  %v195_v47 = vsub.s32 %v128_v40, %v954_v5 }
  0x3b   :  { %vm353_vm3 = vmand %vm225_vm13, %vm289_vm14  ;;  %v112_v48 = vadd.s32 296, %v950_v1  ;;  %v146_v49 = vsub.s32 %v79_v42, %v954_v5  ;;  %v97_v50 = vadd.s32 176, %v950_v1  ;;  %v147_v51 = vsub.s32 %v80_v43, %v954_v5 }
  0x3c   :  { %vm763_vm6 = vmpackc.low %vm353_vm3, %vm352_vm0  ;;  %vm304_vm0 = vcmp.lt.s32.totalorder %v176_v35, 4  ;;  %vm305_vm3 = vcmp.lt.s32.totalorder %v177_v37, 4  ;;  %v178_v52 = vsub.s32 %v111_v44, %v954_v5  ;;  %v98_v53 = vadd.s32 184, %v950_v1 }
  0x3d   :  { %764 = vmatprep.subr.msk.bf16.mxu0 %vm763_vm6, %v909_v19  ;;  %vm384_vm7 = vmand %vm256_vm1, %vm320_vm2  ;;  %vm241_vm2 = vcmp.ge.s32.totalorder %v177_v37, 0  ;;  %vm226_vm6 = vcmp.ge.s32.totalorder %v162_v39, 0  ;;  %v129_v54 = vadd.s32 432, %v950_v1  ;;  %v130_v55 = vadd.s32 440, %v950_v1 }
  0x3e   :  { %vm385_vm10 = vmand %vm257_vm4, %vm321_vm5  ;;  %v81_v56 = vadd.s32 48, %v950_v1  ;;  %v179_v57 = vsub.s32 %v112_v48, %v954_v5  ;;  %v82_v58 = vadd.s32 56, %v950_v1  ;;  %v164_v59 = vsub.s32 %v97_v50, %v954_v5 }
  0x3f   :  { %vm795_vm13 = vmpackc.low %vm385_vm10, %vm384_vm7  ;;  %vm290_vm7 = vcmp.lt.s32.totalorder %v162_v39, 4  ;;  %vm291_vm10 = vcmp.lt.s32.totalorder %v163_v41, 4  ;;  %v113_v60 = vadd.s32 304, %v950_v1  ;;  %v114_v61 = vadd.s32 312, %v950_v1 }
  0x40   :  { %796 = vmatprep.subr.msk.bf16.mxu1 %vm795_vm13, %v909_v19  ;;  %vm336_vm14 = vmand %vm208_vm8, %vm272_vm9  ;;  %vm227_vm9 = vcmp.ge.s32.totalorder %v163_v41, 0  ;;  %vm258_vm13 = vcmp.ge.s32.totalorder %v194_v45, 0  ;;  %v165_v63 = vsub.s32 %v98_v53, %v954_v5  ;;  %v196_v0 = vsub.s32 %v129_v54, %v954_v5 }
  0x41   :  { %vm337_vm1 = vmand %vm209_vm11, %vm273_vm12  ;;  %v197_v2 = vsub.s32 %v130_v55, %v954_v5  ;;  %v1036_v3 = vsub.s32 %v81_v56, %v954_v5  ;;  %v1041_v4 = vsub.s32 %v82_v58, %v954_v5  ;;  %v1050_v7 = vsub.s32 %v113_v60, %v954_v5 }
  0x42   :  { %vm765_vm4 = vmpackc.low %vm337_vm1, %vm336_vm14  ;;  %vm322_vm14 = vcmp.lt.s32.totalorder %v194_v45, 4  ;;  %vm323_vm1 = vcmp.lt.s32.totalorder %v195_v47, 4  ;;  %v1053_v8 = vsub.s32 %v114_v61, %v954_v5  ;;  %v99_v10 = vadd.s32 192, %v950_v1 }
  0x43   :  { %766 = vmatpush3.bf16.msk.msra.mxu0 %vm765_vm4, %v909_v19  ;;  %vm1003_vm5 = vmand %vm240_vm15, %vm304_vm0  ;;  %vm259_vm0 = vcmp.ge.s32.totalorder %v195_v47, 0  ;;  %vm210_vm4 = vcmp.ge.s32.totalorder %v146_v49, 0  ;;  %v100_v11 = vadd.s32 200, %v950_v1  ;;  %v131_v12 = vadd.s32 448, %v950_v1 }
  0x44   :  { %vm369_vm8 = vmand %vm241_vm2, %vm305_vm3  ;;  %v132_v13 = vadd.s32 456, %v950_v1  ;;  %v83_v14 = vadd.s32 64, %v950_v1  ;;  %v84_v15 = vadd.s32 72, %v950_v1  ;;  %v115_v16 = vadd.s32 320, %v950_v1 }
  0x45   :  { %vm797_vm11 = vmpackc.low %vm369_vm8, %vm1003_vm5  ;;  %vm274_vm5 = vcmp.lt.s32.totalorder %v146_v49, 4  ;;  %vm275_vm8 = vcmp.lt.s32.totalorder %v147_v51, 4  ;;  %v133_v17 = vadd.s32 464, %v950_v1  ;;  %v134_v18 = vadd.s32 472, %v950_v1 }
  0x46   :  { %798 = vmatpush3.bf16.msk.msra.mxu1 %vm797_vm11, %v909_v19  ;;  %vm354_vm12 = vmand %vm226_vm6, %vm290_vm7  ;;  %vm211_vm7 = vcmp.ge.s32.totalorder %v147_v51, 0  ;;  %vm325_vm11 = vcmp.lt.s32.totalorder %v197_v2, 4  ;;  %v85_v21 = vadd.s32 80, %v950_v1  ;;  %v86_v22 = vadd.s32 88, %v950_v1 }
  0x47   :  { %vm355_vm15 = vmand %vm227_vm9, %vm291_vm10  ;;  %vm242_vm10 = vcmp.ge.s32.totalorder %v178_v52, 0  ;;  %v117_v23 = vadd.s32 336, %v950_v1  ;;  %v118_v24 = vadd.s32 344, %v950_v1  ;;  %v166_v25 = vsub.s32 %v99_v10, %v954_v5 }
  0x48   :  { %vm767_vm2 = vmpackc.low %vm355_vm15, %vm354_vm12  ;;  %vm306_vm12 = vcmp.lt.s32.totalorder %v178_v52, 4  ;;  %vm277_vm15 = vcmp.lt.s32.totalorder %v1041_v4, 4  ;;  %v167_v26 = vsub.s32 %v100_v11, %v954_v5  ;;  %v1098_v27 = vsub.s32 %v133_v17, %v954_v5  ;;  %v36_v17 = vld [vmem:[#allocation2] sm:$0xff] }
  0x49   :  { %768 = vmatprep.subr.msk.bf16.mxu0 %vm767_vm2, %v909_v19  ;;  %vm1028_vm3 = vmand %vm258_vm13, %vm322_vm14  ;;  %vm292_vm2 = vcmp.lt.s32.totalorder %v164_v59, 4  ;;  %v1101_v28 = vsub.s32 %v134_v18, %v954_v5  ;;  %v1106_v29 = vsub.s32 %v85_v21, %v954_v5  ;;  %v1109_v30 = vsub.s32 %v86_v22, %v954_v5 }
  0x4a   :  { %vm387_vm6 = vmand %vm259_vm0, %vm323_vm1  ;;  %vm229_vm1 = vcmp.ge.s32.totalorder %v165_v63, 0  ;;  %v1112_v31 = vsub.s32 %v117_v23, %v954_v5  ;;  %v1115_v32 = vsub.s32 %v118_v24, %v954_v5  ;;  %v198_v34 = vsub.s32 %v131_v12, %v954_v5  ;;  %v38_v24 = vld [vmem:[#allocation5] sm:$0xff] }
  0x4b   :  { %vm799_vm9 = vmpackc.low %vm387_vm6, %vm1028_vm3  ;;  %vm293_vm3 = vcmp.lt.s32.totalorder %v165_v63, 4  ;;  %vm260_vm6 = vcmp.ge.s32.totalorder %v196_v0, 0  ;;  %v199_v35 = vsub.s32 %v132_v13, %v954_v5  ;;  %v1133_v36 = vsub.s32 %v83_v14, %v954_v5 }
  0x4c   :  { %800 = vmatprep.subr.msk.bf16.mxu1 %vm799_vm9, %v909_v19  ;;  %vm1045_vm13 = vmand %vm210_vm4, %vm274_vm5  ;;  %vm324_vm9 = vcmp.lt.s32.totalorder %v196_v0, 4  ;;  %v116_v37 = vadd.s32 328, %v950_v1  ;;  %v1139_v38 = vsub.s32 %v84_v15, %v954_v5  ;;  %v1142_v39 = vsub.s32 %v115_v16, %v954_v5 }
  0x4d   :  { %vm339_vm0 = vmand %vm211_vm7, %vm275_vm8  ;;  %vm213_vm7 = vcmp.ge.s32.totalorder %v1041_v4, 0  ;;  %vm276_vm8 = vcmp.lt.s32.totalorder %v1036_v3, 4  ;;  %v101_v41 = vadd.s32 208, %v950_v1  ;;  %v102_v42 = vadd.s32 216, %v950_v1 }
  0x4e   :  { %vm769_vm4 = vmpackc.low %vm339_vm0, %vm1045_vm13  ;;  %vm1374_vm13 = vcmp.lt.s32.totalorder %v179_v57, 4  ;;  %vm1375_vm0 = vcmp.ge.s32.totalorder %v179_v57, 0  ;;  %v103_v43 = vadd.s32 224, %v950_v1  ;;  %v104_v44 = vadd.s32 232, %v950_v1 }
  0x4f   :  { %770 = vmatpush3.bf16.msk.msra.mxu0 %vm769_vm4, %v909_v19  ;;  %vm1062_vm14 = vmand %vm242_vm10, %vm306_vm12  ;;  %vm1376_vm12 = vcmp.ge.s32.totalorder %v164_v59, 0  ;;  %v135_v45 = vadd.s32 480, %v950_v1  ;;  %v136_v46 = vadd.s32 488, %v950_v1  ;;  %v87_v47 = vadd.s32 96, %v950_v1 }
  0x50   :  { %vm371_vm5 = vmand %vm1375_vm0, %vm1374_vm13  ;;  %vm308_vm13 = vcmp.lt.s32.totalorder %v1050_v7, 4  ;;  %vm309_vm0 = vcmp.lt.s32.totalorder %v1053_v8, 4  ;;  %v88_v48 = vadd.s32 104, %v950_v1  ;;  %v119_v49 = vadd.s32 352, %v950_v1 }
  0x51   :  { %vm801_vm10 = vmpackc.low %vm371_vm5, %vm1062_vm14  ;;  %vm245_vm5 = vcmp.ge.s32.totalorder %v1053_v8, 0  ;;  %v120_v50 = vadd.s32 360, %v950_v1  ;;  %v1175_v51 = vsub.s32 %v103_v43, %v954_v5  ;;  %v1178_v52 = vsub.s32 %v104_v44, %v954_v5 }
  0x52   :  { %802 = vmatpush3.bf16.msk.msra.mxu1 %vm801_vm10, %v909_v19  ;;  %vm1085_vm4 = vmand %vm1376_vm12, %vm292_vm2  ;;  %vm1381_vm10 = vcmp.ge.s32.totalorder %v197_v2, 0  ;;  %v1181_v53 = vsub.s32 %v135_v45, %v954_v5  ;;  %v1184_v54 = vsub.s32 %v136_v46, %v954_v5  ;;  %v1191_v55 = vsub.s32 %v87_v47, %v954_v5 }
  0x53   :  { %vm357_vm14 = vmand %vm229_vm1, %vm293_vm3  ;;  %vm244_vm3 = vcmp.ge.s32.totalorder %v1050_v7, 0  ;;  %v1194_v56 = vsub.s32 %v88_v48, %v954_v5  ;;  %v1197_v57 = vsub.s32 %v119_v49, %v954_v5  ;;  %v1200_v58 = vsub.s32 %v120_v50, %v954_v5 }
  0x54   :  { %vm771_vm2 = vmpackc.low %vm357_vm14, %vm1085_vm4  ;;  %vm231_vm4 = vcmp.ge.s32.totalorder %v167_v26, 0  ;;  %v183_v59 = vsub.s32 %v116_v37, %v954_v5  ;;  %v168_v61 = vsub.s32 %v101_v41, %v954_v5  ;;  %v169_v62 = vsub.s32 %v102_v42, %v954_v5 }
  0x55   :  { %772 = vmatprep.subr.msk.bf16.mxu0 %vm771_vm2, %v909_v19  ;;  %vm1120_vm1 = vmand %vm260_vm6, %vm324_vm9  ;;  %vm230_vm9 = vcmp.ge.s32.totalorder %v166_v25, 0  ;;  %vm294_vm2 = vcmp.lt.s32.totalorder %v166_v25, 4  ;;  %v105_v0 = vadd.s32 240, %v950_v1  ;;  %v106_v2 = vadd.s32 248, %v950_v1 }
  0x56   :  { %vm389_vm12 = vmand %vm1381_vm10, %vm325_vm11  ;;  %vm1382_vm11 = vcmp.ge.s32.totalorder %v1036_v3, 0  ;;  %v137_v3 = vadd.s32 496, %v950_v1  ;;  %v138_v4 = vadd.s32 504, %v950_v1  ;;  %v89_v6 = vadd.s32 112, %v950_v1 }
  0x57   :  { %vm803_vm6 = vmpackc.low %vm389_vm12, %vm1120_vm1  ;;  %vm295_vm1 = vcmp.lt.s32.totalorder %v167_v26, 4  ;;  %vm326_vm12 = vcmp.lt.s32.totalorder %v198_v34, 4  ;;  %v90_v7 = vadd.s32 120, %v950_v1  ;;  %v121_v8 = vadd.s32 368, %v950_v1  ;;  %v39_v26 = vld [vmem:[#allocation5 + $0x8] sm:$0xff] }
  0x58   :  { %804 = vmatprep.subr.msk.bf16.mxu1 %vm803_vm6, %v909_v19  ;;  %vm1149_vm14 = vmand %vm1382_vm11, %vm276_vm8  ;;  %vm327_vm6 = vcmp.lt.s32.totalorder %v199_v35, 4  ;;  %v122_v9 = vadd.s32 376, %v950_v1  ;;  %v1241_v10 = vsub.s32 %v105_v0, %v954_v5  ;;  %v1244_v11 = vsub.s32 %v106_v2, %v954_v5 }
  0x59   :  { %vm341_vm10 = vmand %vm213_vm7, %vm277_vm15  ;;  %v1247_v12 = vsub.s32 %v137_v3, %v954_v5  ;;  %v1250_v13 = vsub.s32 %v138_v4, %v954_v5  ;;  %v1258_v1 = vsub.s32 %v89_v6, %v954_v5  ;;  %v1261_v14 = vsub.s32 %v90_v7, %v954_v5 }
  0x5a   :  { %vm773_vm8 = vmpackc.low %vm341_vm10, %vm1149_vm14  ;;  %vm214_vm14 = vcmp.ge.s32.totalorder %v1133_v36, 0  ;;  %vm215_vm10 = vcmp.ge.s32.totalorder %v1139_v38, 0  ;;  %v1264_v15 = vsub.s32 %v121_v8, %v954_v5  ;;  %v1267_v16 = vsub.s32 %v122_v9, %v954_v5  ;;  %v37_v5 = vld [vmem:[#allocation2 + $0x8] sm:$0xff] }
  0x5b   :  { %774 = vmatpush3.bf16.msk.msra.mxu0 %vm773_vm8, %v909_v19  ;;  %vm372_vm15 = vmand %vm244_vm3, %vm308_vm13  ;;  %vm262_vm13 = vcmp.ge.s32.totalorder %v198_v34, 0  ;;  %vm278_vm8 = vcmp.lt.s32.totalorder %v1133_v36, 4  ;;  %v40_v18 = vadd.f32 1e-09, %v36_v17  ;;  %v46_v20 = vsub.f32 1.0, %v36_v17 }
  0x5c   :  { %vm373_vm7 = vmand %vm245_vm5, %vm309_vm0  ;;  %vm263_vm0 = vcmp.ge.s32.totalorder %v199_v35, 0  ;;  %v41_v21 = vadd.f32 1e-09, %v37_v5  ;;  %v47_v22 = vsub.f32 1.0, %v37_v5  ;;  %v55_v33 = vmul.f32 %v39_v26, %v39_v26 }
  0x5d   :  { %vm805_vm3 = vmpackc.low %vm373_vm7, %vm372_vm15  ;;  %vm279_vm15 = vcmp.lt.s32.totalorder %v1139_v38, 4  ;;  %vm310_vm7 = vcmp.lt.s32.totalorder %v1142_v39, 4  ;;  %827 = vlog2.f32 %v40_v18  ;;  %v48_v23 = vadd.f32 1e-09, %v46_v20 }
  0x5e   :  { %806 = vmatpush3.bf16.msk.msra.mxu1 %vm805_vm3, %v909_v19  ;;  %vm1206_vm5 = vmand %vm230_vm9, %vm294_vm2  ;;  %vm246_vm2 = vcmp.ge.s32.totalorder %v1142_v39, 0  ;;  %829 = vlog2.f32 %v41_v21  ;;  %v49_v25 = vadd.f32 1e-09, %v47_v22 }
  0x5f   :  { %vm359_vm11 = vmand %vm231_vm4, %vm295_vm1  ;;  %831 = vlog2.f32 %v48_v23 }
  0x60   :  { %vm775_vm9 = vmpackc.low %vm359_vm11, %vm1206_vm5  ;;  %833 = vlog2.f32 %v49_v25 }
  0x61   :  { %776 = vmatprep.subr.msk.bf16.mxu0 %vm775_vm9, %v909_v19  ;;  %vm1224_vm4 = vmand %vm262_vm13, %vm326_vm12  ;;  %vm311_vm12 = vcmp.lt.s32.totalorder %v183_v59, 4 }
  0x62   :  { %vm391_vm1 = vmand %vm263_vm0, %vm327_vm6  ;;  %vm247_vm0 = vcmp.ge.s32.totalorder %v183_v59, 0 }
  0x63   :  { %vm807_vm3 = vmpackc.low %vm391_vm1, %vm1224_vm4  ;;  %vm233_vm4 = vcmp.ge.s32.totalorder %v169_v62, 0  ;;  %vm297_vm1 = vcmp.lt.s32.totalorder %v169_v62, 4 }
  0x64   :  { %808 = vmatprep.subr.msk.bf16.mxu1 %vm807_vm3, %v909_v19  ;;  %vm342_vm5 = vmand %vm214_vm14, %vm278_vm8  ;;  %vm232_vm14 = vcmp.ge.s32.totalorder %v168_v61, 0  ;;  %vm296_vm8 = vcmp.lt.s32.totalorder %v168_v61, 4 }
  0x65   :  { %vm343_vm13 = vmand %vm215_vm10, %vm279_vm15  ;;  %vm264_vm15 = vcmp.ge.s32.totalorder %v1098_v27, 0 }
  0x66   :  { %vm777_vm6 = vmpackc.low %vm343_vm13, %vm342_vm5  ;;  %vm328_vm5 = vcmp.lt.s32.totalorder %v1098_v27, 4  ;;  %v54_v27 = vmul.f32 %v38_v24, %v38_v24 }
  0x67   :  { %778 = vmatpush3.bf16.msk.msra.mxu0 %vm777_vm6, %v909_v19  ;;  %vm374_vm11 = vmand %vm246_vm2, %vm310_vm7  ;;  %vm265_vm2 = vcmp.ge.s32.totalorder %v1101_v28, 0  ;;  %vm329_vm7 = vcmp.lt.s32.totalorder %v1101_v28, 4  ;;  %vm216_vm6 = vcmp.ge.s32.totalorder %v1106_v29, 0  ;;  %v60_v28 = vmul.f32 %v36_v17, %v36_v17  ;;  %v828_v36 = vpop.eup %827 }
  0x68   :  { %vm375_vm9 = vmand %vm247_vm0, %vm311_vm12  ;;  %v43_v38 = vmul.f32 0.6931472, %v828_v36 }
  0x69   :  { %vm809_vm3 = vmpackc.low %vm375_vm9, %vm374_vm11  ;;  %vm280_vm11 = vcmp.lt.s32.totalorder %v1106_v29, 4  ;;  %vm281_vm9 = vcmp.lt.s32.totalorder %v1109_v30, 4  ;;  %v61_v29 = vmul.f32 %v37_v5, %v37_v5  ;;  %v62_v34 = vmul.f32 0.25, %v60_v28 }
  0x6a   :  { %810 = vmatpush3.bf16.msk.msra.mxu1 %vm809_vm3, %v909_v19  ;;  %vm360_vm10 = vmand %vm232_vm14, %vm296_vm8  ;;  %vm217_vm8 = vcmp.ge.s32.totalorder %v1109_v30, 0  ;;  %vm248_vm3 = vcmp.ge.s32.totalorder %v1112_v31, 0  ;;  %v58_v30 = vsub.f32 %v38_v24, %v54_v27  ;;  %v66_v44 = vmul.f32 %v54_v27, %v43_v38 }
  0x6b   :  { %vm361_vm13 = vmand %vm233_vm4, %vm297_vm1  ;;  %v63_v35 = vmul.f32 0.25, %v61_v29 }
  0x6c   :  { %vm779_vm0 = vmpackc.low %vm361_vm13, %vm360_vm10  ;;  %vm312_vm10 = vcmp.lt.s32.totalorder %v1112_v31, 4  ;;  %vm313_vm13 = vcmp.lt.s32.totalorder %v1115_v32, 4  ;;  %v59_v31 = vsub.f32 %v39_v26, %v55_v33 }
  0x6d   :  { %780 = vmatprep.subr.msk.bf16.mxu0 %vm779_vm0, %v909_v19  ;;  %vm392_vm12 = vmand %vm264_vm15, %vm328_vm5  ;;  %vm249_vm5 = vcmp.ge.s32.totalorder %v1115_v32, 0  ;;  %v830_v32 = vpop.eup %829 }
  0x6e   :  { %vm393_vm14 = vmand %vm265_vm2, %vm329_vm7  ;;  %vm234_vm7 = vcmp.ge.s32.totalorder %v1175_v51, 0  ;;  %v832_v39 = vpop.eup %831  ;;  %v45_v41 = vmul.f32 0.6931472, %v830_v32 }
  0x6f   :  { %vm811_vm4 = vmpackc.low %vm393_vm14, %vm392_vm12  ;;  %vm235_vm12 = vcmp.ge.s32.totalorder %v1178_v52, 0  ;;  %vm299_vm14 = vcmp.lt.s32.totalorder %v1178_v52, 4  ;;  %v834_v42 = vpop.eup %833  ;;  %v51_v43 = vmul.f32 0.6931472, %v832_v39 }
  0x70   :  { %812 = vmatprep.subr.msk.bf16.mxu1 %vm811_vm4, %v909_v19  ;;  %vm344_vm1 = vmand %vm216_vm6, %vm280_vm11  ;;  %vm298_vm6 = vcmp.lt.s32.totalorder %v1175_v51, 4  ;;  %vm57_vm4 = vcmp.ne.f32.partialorder %v39_v26, 0.0  ;;  %v53_v46 = vmul.f32 0.6931472, %v834_v42  ;;  %v67_v47 = vmul.f32 %v55_v33, %v45_v41 }
  0x71   :  { %vm345_vm15 = vmand %vm217_vm8, %vm281_vm9  ;;  %vm56_vm8 = vcmp.ne.f32.partialorder %v38_v24, 0.0  ;;  %v65_v45 = vsel %vm57_vm4, %v59_v31, %v63_v35  ;;  %vm250_vm4 = vcmp.ge.s32.totalorder %v1197_v57, 0 }
  0x72   :  { %vm781_vm2 = vmpackc.low %vm345_vm15, %vm344_vm1  ;;  %v64_v40 = vsel %vm56_vm8, %v58_v30, %v62_v34  ;;  %v69_v49 = vmul.f32 %v65_v45, %v53_v46 }
  0x73   :  { %782 = vmatpush3.bf16.msk.msra.mxu0 %vm781_vm2, %v909_v19  ;;  %vm376_vm0 = vmand %vm248_vm3, %vm312_vm10  ;;  %vm266_vm3 = vcmp.ge.s32.totalorder %v1181_v53, 0  ;;  %vm330_vm10 = vcmp.lt.s32.totalorder %v1181_v53, 4  ;;  %v68_v48 = vmul.f32 %v64_v40, %v51_v43 }
  0x74   :  { %vm377_vm11 = vmand %vm249_vm5, %vm313_vm13  ;;  %vm267_vm5 = vcmp.ge.s32.totalorder %v1184_v54, 0  ;;  %vm331_vm13 = vcmp.lt.s32.totalorder %v1184_v54, 4  ;;  %v71_v51 = vadd.f32 %v69_v49, %v67_v47 }
  0x75   :  { %vm813_vm9 = vmpackc.low %vm377_vm11, %vm376_vm0  ;;  %vm218_vm0 = vcmp.ge.s32.totalorder %v1191_v55, 0  ;;  %vm219_vm11 = vcmp.ge.s32.totalorder %v1194_v56, 0  ;;  %v70_v50 = vadd.f32 %v68_v48, %v66_v44 }
  0x76   :  { %814 = vmatpush3.bf16.msk.msra.mxu1 %vm813_vm9, %v909_v19  ;;  %vm1301_vm1 = vmand %vm234_vm7, %vm298_vm6  ;;  %v73_v53 = vsub.f32 0.0, %v71_v51 }
  0x77   :  { %vm363_vm15 = vmand %vm235_vm12, %vm299_vm14  ;;  %vm282_vm12 = vcmp.lt.s32.totalorder %v1191_v55, 4  ;;  %vm283_vm14 = vcmp.lt.s32.totalorder %v1194_v56, 4  ;;  %v72_v52 = vsub.f32 0.0, %v70_v50 }
  0x78   :  { %vm783_vm2 = vmpackc.low %vm363_vm15, %vm1301_vm1  ;;  %vm314_vm1 = vcmp.lt.s32.totalorder %v1197_v57, 4  ;;  %vm315_vm15 = vcmp.lt.s32.totalorder %v1200_v58, 4  ;;  %v465_v55 = vcombine.high %v73_v53, %v73_v53 }
  0x79   :  { %784 = vmatprep.subr.msk.bf16.mxu0 %vm783_vm2, %v909_v19  ;;  %vm394_vm7 = vmand %vm266_vm3, %vm330_vm10  ;;  %vm251_vm10 = vcmp.ge.s32.totalorder %v1200_v58, 0  ;;  %vm236_vm2 = vcmp.ge.s32.totalorder %v1241_v10, 0  ;;  %v464_v54 = vcombine.high %v72_v52, %v72_v52 }
  0x7a   :  { %vm395_vm6 = vmand %vm267_vm5, %vm331_vm13  ;;  %602 = vmatprep.mubr.f32.mxu1 %v465_v55 }
  0x7b   :  { %vm815_vm8 = vmpackc.low %vm395_vm6, %vm394_vm7  ;;  %vm300_vm7 = vcmp.lt.s32.totalorder %v1241_v10, 4  ;;  %vm301_vm6 = vcmp.lt.s32.totalorder %v1244_v11, 4  ;;  %532 = vmatprep.mubr.f32.mxu0 %v464_v54 }
  0x7c   :  { %816 = vmatprep.subr.msk.bf16.mxu1 %vm815_vm8, %v909_v19  ;;  %vm346_vm9 = vmand %vm218_vm0, %vm282_vm12  ;;  %vm237_vm12 = vcmp.ge.s32.totalorder %v1244_v11, 0  ;;  %vm268_vm8 = vcmp.ge.s32.totalorder %v1247_v12, 0 }
  0x7d   :  { %vm347_vm3 = vmand %vm219_vm11, %vm283_vm14 }
  0x7e   :  { %vm785_vm5 = vmpackc.low %vm347_vm3, %vm346_vm9  ;;  %vm332_vm9 = vcmp.lt.s32.totalorder %v1247_v12, 4  ;;  %vm333_vm3 = vcmp.lt.s32.totalorder %v1250_v13, 4 }
  0x7f   :  { %786 = vmatpush3.bf16.msk.msra.mxu0 %vm785_vm5, %v909_v19  ;;  %vm378_vm13 = vmand %vm250_vm4, %vm314_vm1  ;;  %vm269_vm1 = vcmp.ge.s32.totalorder %v1250_v13, 0  ;;  %vm220_vm5 = vcmp.ge.s32.totalorder %v1258_v1, 0 }
  0x80   :  { %vm379_vm0 = vmand %vm251_vm10, %vm315_vm15 }
  0x81   :  { %vm817_vm11 = vmpackc.low %vm379_vm0, %vm378_vm13  ;;  %vm284_vm13 = vcmp.lt.s32.totalorder %v1258_v1, 4  ;;  %vm285_vm0 = vcmp.lt.s32.totalorder %v1261_v14, 4 }
  0x82   :  { %818 = vmatpush3.bf16.msk.msra.mxu1 %vm817_vm11, %v909_v19  ;;  %vm364_vm14 = vmand %vm236_vm2, %vm300_vm7  ;;  %vm221_vm7 = vcmp.ge.s32.totalorder %v1261_v14, 0 }
  0x83   :  { %vm365_vm4 = vmand %vm237_vm12, %vm301_vm6  ;;  %vm252_vm6 = vcmp.ge.s32.totalorder %v1264_v15, 0 }
  0x84   :  { %vm787_vm10 = vmpackc.low %vm365_vm4, %vm364_vm14  ;;  %vm316_vm14 = vcmp.lt.s32.totalorder %v1264_v15, 4 }
  0x85   :  { %788 = vmatprep.subr.msk.bf16.mxu0 %vm787_vm10, %v909_v19  ;;  %vm396_vm15 = vmand %vm268_vm8, %vm332_vm9  ;;  %vm253_vm8 = vcmp.ge.s32.totalorder %v1267_v16, 0  ;;  %vm317_vm9 = vcmp.lt.s32.totalorder %v1267_v16, 4 }
  0x86   :  { %vm397_vm2 = vmand %vm269_vm1, %vm333_vm3 }
  0x87   :  { %vm819_vm11 = vmpackc.low %vm397_vm2, %vm396_vm15 }
  0x88   :  { %820 = vmatprep.subr.msk.bf16.mxu1 %vm819_vm11, %v909_v19  ;;  %vm348_vm12 = vmand %vm220_vm5, %vm284_vm13 }
  0x89   :  { %vm349_vm4 = vmand %vm221_vm7, %vm285_vm0 }
  0x8a   :  { %vm789_vm10 = vmpackc.low %vm349_vm4, %vm348_vm12 }
  0x8b   :  { %790 = vmatpush3.bf16.msk.msra.mxu0 %vm789_vm10, %v909_v19  ;;  %vm380_vm1 = vmand %vm252_vm6, %vm316_vm14 }
  0x8c   :  { %vm381_vm3 = vmand %vm253_vm8, %vm317_vm9 }
  0x8d   :  { %vm821_vm2 = vmpackc.low %vm381_vm3, %vm380_vm1 }
  0x8e   :  { %822 = vmatpush3.bf16.msk.msra.mxu1 %vm821_vm2, %v909_v19  ;;  %533 = vmatmul.mubr.f32.vlgmr.msra.gmra.mrb[0].mxu0 %v72_v52 }
  0x91   :  { %603 = vmatmul.mubr.f32.vlgmr.msra.gmra.mrb[0].mxu1 %v73_v53 }
 0x161   :  { %v721_v56 = vpop.f32.mrb[0].mxu0 }
 0x162   :  { %v722_v57 = vpop.f32.mrb[1].mxu0 }
 0x163   :  { %v723_v58 = vadd.f32 %v722_v57, %v721_v56 }
 0x164   :  { %v756_v59 = vpop.f32.mrb[0].mxu1 }
 0x165   :  { %v757_v60 = vpop.f32.mrb[1].mxu1 }
 0x166   :  { %v758_v61 = vadd.f32 %v757_v60, %v756_v59 }
 0x168   :  { %v605_v62 = vadd.f32 %v758_v61, %v723_v58 }
 0x16a   :  { %608 = vst [vmem:[#allocation7] sm:$0xf] %v605_v62 }
 0x16b   :  { %890 = shalt.err (!%p887_p6)
}
 0x16c   :  { %s891_s8 = scalar_lea.hbm %s1365_s2, 64 }
 0x16d   :  { %p892_p7 = scmp.ne.s32.totalorder %s1365_s2, %s891_s8  ;;  %p895_p8 = scmp.lt.u32.totalorder %s891_s8, %s1365_s2 }
 0x16f   :  { %p897_p9 = pnand %p895_p8, %p892_p7 }
 0x171   :  { %900 = shalt.err (!%p897_p9)
}
 0x172   :  { %618 = dma.vmem_to_hbm [thread:$0]  %s616_s4, 64, %s1365_s2, [#allocation4]  }
 0x173   :  { %905 = dma.done.wait [#allocation4], 64  }
 0x174   :  { %906 = vsyncadd [#allocation4], 4294967232 }
 0x175   :  { %622 = vsyncpa [#allocation3], 1 }
 0x176   :  { %623 = vsyncpa [#allocation6], 1 }
 0x177   :  { %624 = vsyncpa [#allocation4], 1 }

</bundles_post_ra>
